<compile_context>
chip_gen: v7x
topology: tpu7x:2x2x1
jax: 0.10.0
libtpu: 0.0.40
codegen_flags: <defaults>
</compile_context>

<pallas_src>
import jax
import jax.numpy as jnp
from jax.experimental import pallas as pl
from jax.experimental.pallas import tpu as pltpu


def _mlp_kernel(x_ref, wgu_ref, wd_ref, o_ref, acc_ref):
    # Reduction axis (intermediate tiles) is the LAST grid axis.
    j = pl.program_id(1)

    @pl.when(j == 0)
    def _():
        acc_ref[...] = jnp.zeros_like(acc_ref)

    x = x_ref[...]
    # Fused gate|up projection: one matmul [tile_t, H] x [H, 2*tile_i] -> f32.
    gu = jnp.dot(x, wgu_ref[...], preferred_element_type=jnp.float32)
    ti = wgu_ref.shape[1] // 2
    g = gu[:, :ti]
    u = gu[:, ti:]
    # SiLU(gate) * up  (Deepseek hidden_act = "silu"); sigmoid goes to the EUP slot.
    h = (g * jax.nn.sigmoid(g)) * u
    # Partial down projection for this intermediate tile; accumulate in f32.
    acc_ref[...] += jnp.dot(h.astype(wd_ref.dtype), wd_ref[...],
                            preferred_element_type=jnp.float32)

    @pl.when(j == pl.num_programs(1) - 1)
    def _():
        o_ref[...] = acc_ref[...].astype(o_ref.dtype)


def fuse_gate_up_weights(wg, wu, tile_i):
    """Build the tile-interleaved fused gate|up weight [H, 2I].

    Column block j of the result is [gate tile j | up tile j] for tile width tile_i,
    so the kernel needs a single (H, 2*tile_i) weight DMA per grid step.
    Call this ONCE per model (outside jit / the serving loop), not per forward.
    """
    H, I = wg.shape
    assert wu.shape == (H, I)
    assert tile_i % 128 == 0 and I % tile_i == 0
    n_i = I // tile_i
    return jnp.stack(
        [wg.reshape(H, n_i, tile_i), wu.reshape(H, n_i, tile_i)], axis=2
    ).reshape(H, 2 * I)


def deepseek_v2_mlp(x, wgu, wd, *, tile_t=512, tile_i=256,
                    vmem_limit_bytes=None, weight_buffers=None):
    """x: [T, H]; wgu: [H, 2I] (from fuse_gate_up_weights with the SAME tile_i);
    wd: [I, H] -> [T, H].

    tile_t: token tile (multiple of 16).  tile_i: intermediate tile (multiple of 128).

    Generation guidance (arithmetic intensity of this grid ~ tile_t FLOP/byte since
    weights are re-streamed per token tile):
      v6e (128 MiB VMEM): prefill tile_t=640-768, tile_i=256-512;
                          decode tile_i=1024, weight_buffers=3.
      v7x (64 MiB VMEM):  prefill tile_t=512, tile_i=256 (do NOT use tile_i=512 with
                          tile_t>=512 or weight_buffers=3 at those tiles).
      v5e (128 MiB VMEM): tile_t=256, tile_i=256.
    """
    T, H = x.shape
    I = wd.shape[0]
    assert wd.shape == (I, H)
    assert wgu.shape == (H, 2 * I)
    assert tile_i % 128 == 0 and I % tile_i == 0, "tile_i must divide I and be 128-aligned"
    assert tile_t % 16 == 0, "tile_t must be a multiple of 16 (bf16 sublane packing)"

    # Token tiling: shrink tile to the (16-rounded) token count if T is small, then pad.
    t16 = ((max(T, 1) + 15) // 16) * 16
    tt = min(tile_t, t16)
    T_pad = ((T + tt - 1) // tt) * tt
    if T_pad != T:
        x = jnp.pad(x, ((0, T_pad - T), (0, 0)))

    n_i = I // tile_i
    n_t = T_pad // tt
    grid = (n_t, n_i)

    x_bytes = x.dtype.itemsize
    w_bytes = wgu.dtype.itemsize
    o_bytes = x.dtype.itemsize
    wb = 2 if weight_buffers is None else weight_buffers
    if vmem_limit_bytes is None:
        need = (2 * tt * H * x_bytes                            # x, double-buffered
                + wb * (H * 2 * tile_i + tile_i * H) * w_bytes  # wgu+wd tiles, wb-deep
                + 2 * tt * H * o_bytes                          # out, double-buffered
                + tt * H * 4                                    # f32 accumulator scratch
                + 2 * tt * 2 * tile_i * 4)                      # f32 gu and h intermediates
        vmem_limit_bytes = max(int(need * 1.2) + (2 << 20), 32 << 20)

    # Weights are re-DMA'd for every token tile (their index_maps depend only on j).
    cost = pl.CostEstimate(
        flops=6 * T_pad * H * I,
        transcendentals=T_pad * I,
        bytes_accessed=n_t * 3 * H * I * w_bytes + T_pad * H * (x_bytes + o_bytes),
    )

    w_kwargs = {} if weight_buffers is None else dict(
        pipeline_mode=pl.Buffered(weight_buffers))

    out = pl.pallas_call(
        _mlp_kernel,
        out_shape=jax.ShapeDtypeStruct((T_pad, H), x.dtype),
        grid_spec=pltpu.PrefetchScalarGridSpec(
            num_scalar_prefetch=0,
            grid=grid,
            in_specs=[
                pl.BlockSpec((tt, H), lambda t, j: (t, 0)),              # x tile
                pl.BlockSpec((H, 2 * tile_i), lambda t, j: (0, j),       # fused gate|up
                             **w_kwargs),
                pl.BlockSpec((tile_i, H), lambda t, j: (j, 0),           # down tile
                             **w_kwargs),
            ],
            out_specs=pl.BlockSpec((tt, H), lambda t, j: (t, 0)),
            scratch_shapes=[pltpu.VMEM((tt, H), jnp.float32)],
        ),
        compiler_params=pltpu.CompilerParams(
            dimension_semantics=("parallel", "arbitrary"),   # T parallel, I reduction
            vmem_limit_bytes=vmem_limit_bytes,
        ),
        cost_estimate=cost,
    )(x, wgu, wd)
    return out[:T]


if __name__ == "__main__":
    # Small synthetic shapes consistent with the module (scaled-down hidden sizes).
    batch, seq = 2, 16
    hidden_size = 256
    intermediate_size = 512

    key = jax.random.PRNGKey(0)
    kx, kg, ku, kd = jax.random.split(key, 4)

    x = jax.random.normal(kx, (batch, seq, hidden_size), dtype=jnp.float32)
    # nn.Linear(hidden, inter, bias=False).weight is [inter, hidden]; forward does
    # x @ W.T, so we materialize the transposed weights directly.
    wg = jax.random.normal(kg, (hidden_size, intermediate_size), dtype=jnp.float32) * 0.02
    wu = jax.random.normal(ku, (hidden_size, intermediate_size), dtype=jnp.float32) * 0.02
    wd = jax.random.normal(kd, (intermediate_size, hidden_size), dtype=jnp.float32) * 0.02

    x2d = x.reshape(batch * seq, hidden_size)

    # Reference (plain JAX).
    g_ref = x2d @ wg
    u_ref = x2d @ wu
    ref = ((g_ref * jax.nn.sigmoid(g_ref)) * u_ref) @ wd

    # float32 path (tight check); small tiles exercise both grid axes (2 x 2 grid).
    wgu_f32 = fuse_gate_up_weights(wg, wu, tile_i=256)     # hoisted: fuse once
    out2d = deepseek_v2_mlp(x2d, wgu_f32, wd, tile_t=16, tile_i=256)
    jax.block_until_ready(out2d)
    assert jnp.allclose(out2d, ref, atol=1e-4, rtol=1e-4), "f32 mismatch vs reference"
    out3d = out2d.reshape(batch, seq, hidden_size)  # module-shaped output

    # Padding path: T not a multiple of tile_t (20 tokens -> padded to 32, cropped back).
    out_odd = deepseek_v2_mlp(x2d[:20], wgu_f32, wd, tile_t=16, tile_i=256)
    jax.block_until_ready(out_odd)
    assert out_odd.shape == (20, hidden_size)
    assert jnp.allclose(out_odd, ref[:20], atol=1e-4, rtol=1e-4), "padded-T mismatch"

    # bfloat16 path (production dtype: bf16 weights/activations, f32 accumulation),
    # with 3-deep weight buffering to exercise the deeper-pipelining VMEM budget.
    xb = x2d.astype(jnp.bfloat16)
    wgb, wub, wdb = (a.astype(jnp.bfloat16) for a in (wg, wu, wd))
    wgu_bf16 = fuse_gate_up_weights(wgb, wub, tile_i=128)
    outb = deepseek_v2_mlp(xb, wgu_bf16, wdb, tile_t=16, tile_i=128, weight_buffers=3)
    jax.block_until_ready(outb)
    gb = xb.astype(jnp.float32) @ wgb.astype(jnp.float32)
    ub = xb.astype(jnp.float32) @ wub.astype(jnp.float32)
    hb = ((gb * jax.nn.sigmoid(gb)) * ub).astype(jnp.bfloat16).astype(jnp.float32)
    refb = hb @ wdb.astype(jnp.float32)
    assert jnp.allclose(outb.astype(jnp.float32), refb, atol=2e-2, rtol=2e-2), \
        "bf16 mismatch vs reference"

    print("KERNEL_OK")
</pallas_src>

<mosaic_0001>
module attributes {stable_mosaic.version = 11 : i64} {
  func.func @_mlp_kernel(%arg0: i32, %arg1: i32, %arg2: memref<16x256xf32, #tpu.memory_space<vmem>>, %arg3: memref<256x512xf32, #tpu.memory_space<vmem>>, %arg4: memref<256x256xf32, #tpu.memory_space<vmem>>, %arg5: memref<16x256xf32, #tpu.memory_space<vmem>>, %arg6: memref<16x256xf32, #tpu.memory_space<vmem>>) attributes {dimension_semantics = [#tpu.dimension_semantics<parallel>, #tpu.dimension_semantics<arbitrary>], iteration_bounds = array<i64: 2, 2>, scalar_prefetch = 0 : i64, scratch_operands = 1 : i64, tpu.core_type = #tpu.core_type<tc>, window_params = [{transform_indices = @transform_0, window_bounds = array<i64: 16, 256>}, {transform_indices = @transform_1, window_bounds = array<i64: 256, 512>}, {transform_indices = @transform_2, window_bounds = array<i64: 256, 256>}, {transform_indices = @transform_3, window_bounds = array<i64: 16, 256>}]} {
    %c0_i32 = arith.constant 0 : i32
    %0 = arith.cmpi eq, %arg1, %c0_i32 : i32
    %1 = arith.extui %0 : i1 to i32
    %c0_i32_0 = arith.constant 0 : i32
    %2 = arith.cmpi ne, %1, %c0_i32_0 : i32
    scf.if %2 {
      %cst_13 = arith.constant 0.000000e+00 : f32
      %23 = vector.broadcast %cst_13 : f32 to vector<16x256xf32>
      %c0_14 = arith.constant 0 : index
      %c0_15 = arith.constant 0 : index
      %24 = vector.load %arg6[%c0_14, %c0_15] : memref<16x256xf32, #tpu.memory_space<vmem>>, vector<16x256xf32>
      tpu.vector_store %arg6[%c0_14, %c0_15], %23 {strides = array<i32>} : memref<16x256xf32, #tpu.memory_space<vmem>>, vector<16x256xf32>,
    } else {
    }
    %c0 = arith.constant 0 : index
    %c0_1 = arith.constant 0 : index
    %3 = vector.load %arg2[%c0, %c0_1] : memref<16x256xf32, #tpu.memory_space<vmem>>, vector<16x256xf32>
    %c0_2 = arith.constant 0 : index
    %c0_3 = arith.constant 0 : index
    %4 = vector.load %arg3[%c0_2, %c0_3] : memref<256x512xf32, #tpu.memory_space<vmem>>, vector<256x512xf32>
    %cst = arith.constant dense<0.000000e+00> : vector<16x512xf32>
    %5 = tpu.matmul %3, %4, %cst {dimension_numbers = #tpu.dot_dimension_numbers<[1], [0], [0], [1], [0, 0, 1, 1], [], []>} : vector<16x256xf32>, vector<256x512xf32>, vector<16x512xf32> -> vector<16x512xf32>
    %6 = vector.extract_strided_slice %5 {offsets = [0, 0], sizes = [16, 256], strides = [1, 1]} : vector<16x512xf32> to vector<16x256xf32>
    %7 = vector.extract_strided_slice %5 {offsets = [0, 256], sizes = [16, 256], strides = [1, 1]} : vector<16x512xf32> to vector<16x256xf32>
    %8 = arith.negf %6 : vector<16x256xf32>
    %9 = math.exp %8 : vector<16x256xf32>
    %cst_4 = arith.constant 1.000000e+00 : f32
    %10 = vector.broadcast %cst_4 : f32 to vector<16x256xf32>
    %11 = arith.addf %10, %9 : vector<16x256xf32>
    %12 = arith.divf %10, %11 : vector<16x256xf32>
    %13 = arith.mulf %6, %12 : vector<16x256xf32>
    %14 = arith.mulf %13, %7 : vector<16x256xf32>
    %c0_5 = arith.constant 0 : index
    %c0_6 = arith.constant 0 : index
    %15 = vector.load %arg6[%c0_5, %c0_6] : memref<16x256xf32, #tpu.memory_space<vmem>>, vector<16x256xf32>
    %c0_7 = arith.constant 0 : index
    %c0_8 = arith.constant 0 : index
    %16 = vector.load %arg4[%c0_7, %c0_8] : memref<256x256xf32, #tpu.memory_space<vmem>>, vector<256x256xf32>
    %cst_9 = arith.constant dense<0.000000e+00> : vector<16x256xf32>
    %17 = tpu.matmul %14, %16, %cst_9 {dimension_numbers = #tpu.dot_dimension_numbers<[1], [0], [0], [1], [0, 0, 1, 1], [], []>} : vector<16x256xf32>, vector<256x256xf32>, vector<16x256xf32> -> vector<16x256xf32>
    %18 = arith.addf %15, %17 : vector<16x256xf32>
    %c0_10 = arith.constant 0 : index
    %c0_11 = arith.constant 0 : index
    %19 = vector.load %arg6[%c0_10, %c0_11] : memref<16x256xf32, #tpu.memory_space<vmem>>, vector<16x256xf32>
    tpu.vector_store %arg6[%c0_10, %c0_11], %18 {strides = array<i32>} : memref<16x256xf32, #tpu.memory_space<vmem>>, vector<16x256xf32>,
    %c1_i32 = arith.constant 1 : i32
    %20 = arith.cmpi eq, %arg1, %c1_i32 : i32
    %21 = arith.extui %20 : i1 to i32
    %c0_i32_12 = arith.constant 0 : i32
    %22 = arith.cmpi ne, %21, %c0_i32_12 : i32
    scf.if %22 {
      %c0_13 = arith.constant 0 : index
      %c0_14 = arith.constant 0 : index
      %23 = vector.load %arg6[%c0_13, %c0_14] : memref<16x256xf32, #tpu.memory_space<vmem>>, vector<16x256xf32>
      %c0_15 = arith.constant 0 : index
      %c0_16 = arith.constant 0 : index
      %24 = vector.load %arg5[%c0_15, %c0_16] : memref<16x256xf32, #tpu.memory_space<vmem>>, vector<16x256xf32>
      tpu.vector_store %arg5[%c0_15, %c0_16], %23 {strides = array<i32>} : memref<16x256xf32, #tpu.memory_space<vmem>>, vector<16x256xf32>,
    } else {
    }
    return
  }
  func.func @transform_0(%arg0: i32, %arg1: i32) -> (i32, i32) {
    %c0_i32 = arith.constant 0 : i32
    %c0_i32_0 = arith.constant 0 : i32
    return %arg0, %c0_i32 : i32, i32
  }
  func.func @transform_1(%arg0: i32, %arg1: i32) -> (i32, i32) {
    %c0_i32 = arith.constant 0 : i32
    %c0_i32_0 = arith.constant 0 : i32
    return %c0_i32, %arg1 : i32, i32
  }
  func.func @transform_2(%arg0: i32, %arg1: i32) -> (i32, i32) {
    %c0_i32 = arith.constant 0 : i32
    %c0_i32_0 = arith.constant 0 : i32
    return %arg1, %c0_i32 : i32, i32
  }
  func.func @transform_3(%arg0: i32, %arg1: i32) -> (i32, i32) {
    %c0_i32 = arith.constant 0 : i32
    %c0_i32_0 = arith.constant 0 : i32
    return %arg0, %c0_i32 : i32, i32
  }
}

</mosaic_0001>

<bundles_post_ra>
// kernel: tpu_custom_call.1
= control target key start
LH: loop header
LB: loop body
LE: loop exit
PB: predicated region body
PF: predicated region fallthrough
CT: control target
= control target key end

     0   :  { %s2136_s0 = inlined_call_operand.hbm [shape: f32[32,256], index: 0, kind: input, shape index: {}]   ;;  %s2137_s1 = inlined_call_operand.hbm [shape: f32[256,1024], index: 1, kind: input, shape index: {}]   ;;  %s2138_s2 = inlined_call_operand.hbm [shape: f32[512,256], index: 2, kind: input, shape index: {}]   ;;  %s2139_s3 = inlined_call_operand.hbm [shape: f32[32,256], index: 3, kind: output, shape index: {}]  }
   0x1   :  { %2152 = sst [smem:[#allocation19_spill]] %s2136_s0 }
   0x2   :  { %2153 = sst [smem:[#allocation20_spill]] %s2137_s1 }
   0x3   :  { %2154 = sst [smem:[#allocation21_spill]] %s2139_s3 }
   0x4   :  { %8 = vsyncpa [#allocation4], 0 }
   0x5   :  { %10 = vsyncpa [#allocation4 + $0x1], 0 }
   0x6   :  { %11 = vsyncpa [#allocation7], 0 }
   0x7   :  { %13 = vsyncpa [#allocation7 + $0x1], 0 }
   0x8   :  { %14 = vsyncpa [#allocation5], 0 }
   0x9   :  { %16 = vsyncpa [#allocation5 + $0x1], 0  ;;  %s1566_s12 = smov 0   ;;  %s1568_s13 = smov 0  }
   0xa   :  { %s1570_s14 = smov 0   ;;  %s1572_s15 = smov 0  }
   0xb   :  { %s1574_s16 = smov 0   ;;  %s1576_s17 = smov 0  }
   0xc   :  { %s1578_s18 = smov 0   ;;  %s1580_s19 = smov 0  }
   0xd   :  { %s1582_s20 = smov 0   ;;  %s1584_s21 = smov 0  }
   0xe   :  { %s1586_s22 = smov 0  }
   0xf LB: > { %2155 = sst [smem:[#allocation13_spill]] %s1512_s17  ;;  %s31_s23 = sadd.s32 1, %s1524_s20  ;;  %s1532_s22 = sphi %s1586_s22, %s22_s22   ;;  %s1528_s21 = sphi %s1584_s21, %s2190_s21   ;;  %s1524_s20 = sphi %s1582_s20, %s2197_s20   ;;  %s1520_s19 = sphi %s1580_s19, %s2188_s19   ;;  %s1516_s18 = sphi %s1578_s18, %s2196_s18   ;;  %s1512_s17 = sphi %s1576_s17, %s2187_s17   ;;  %s1508_s16 = sphi %s1574_s16, %s2195_s16   ;;  %s1504_s15 = sphi %s1572_s15, %s2194_s15   ;;  %s1500_s14 = sphi %s1570_s14, %s2193_s14   ;;  %s1496_s13 = sphi %s1568_s13, %s2192_s13   ;;  %s1492_s12 = sphi %s1566_s12, %s2191_s12  }
  0x10   : > { %2156 = sst [smem:[#allocation14_spill]] %s1528_s21  ;;  %p2141_p0 = scmp.eq.s32.totalorder %s1532_s22, 0 }
  0x11   : > { %p1623_p1 = scmp.ge.s32.totalorder %s31_s23, 2  ;;  %s67_s25 = sadd.s32 1, %s1500_s14 }
  0x12   : > { %p74_p2 = scmp.ne.s32.totalorder %s1500_s14, %s1496_s13  ;;  %p2140_p5 = scmp.lt.s32.totalorder %s1532_s22, 4 }
  0x13   : > { %s2199_s23 = smov (%p1623_p1, %s31_s23), 0  ;;  %s178_s27 = sand.u32 1, %s1532_s22  }
  0x14   : > { %2158 = sst [smem:[#allocation15_spill]] %s2199_s23  ;;  %p76_p4 = por %p74_p2, %p2141_p0 }
  0x15   : > { %s64_s26 = ssub.s32 %s1524_s20, %s2199_s23  ;;  %s2142_s28 = sand.u32 1, %s1500_s14  }
  0x16   : > { %p65_p6 = scmp.eq.s32.totalorder %s64_s26, 0  ;;  %s925_s30 = sshll.u32 %s2142_s28, 10 }
  0x17   : > { %s951_s4 = sshll.u32 %s1524_s20, 9  ;;  %s2160_s1 = sld [smem:[#allocation20_spill]] }
  0x18   : > { %s1644_s29 = scalar_select %p65_p6, %s1500_s14, %s67_s25  }
  0x19   : > { %s182_s8 = scalar_lea.vmem [#allocation6], %s925_s30  ;;  %p1656_p7 = pnand %p2140_p5, %p76_p4 }
  0x1a   : > { %2159 = sst [smem:[#allocation16_spill]] %s1644_s29  ;;  %s189_s9 = sshll.u32 %s182_s8, 4  ;;  %s1660_s9 = int_to_ptr.vmem [resolvable:$true] %s189_s9 }
  0x1b   : > { %s1663_s11 = scalar_lea.sflag [#allocation7], %s178_s27  ;;  %p2143_p10 = pneg %p1656_p7 }
  0x1d   : > { %s1652_s7 = scalar_lea.hbm %s2160_s1, %s951_s4  ;;  %s1321_s4 = scalar_lea.hbm %s2160_s1, 32768 }
  0x1e   : > { %s1316_s25 = scalar_lea.hbm %s1652_s7, 16384  ;;  %p1322_p13 = scmp.lt.u32.totalorder %s1652_s7, %s2160_s1 }
  0x1f   : > { %p1317_p9 = scmp.ne.s32.totalorder %s1652_s7, %s1316_s25  ;;  %p1323_p2 = scmp.lt.u32.totalorder %s1321_s4, %s1316_s25 }
  0x20   : > { %p1325_p6 = scmp.lt.u32.totalorder %s1316_s25, %s1652_s7 }
  0x21   : > { %p1319_p11 = pnand %p2143_p10, %p1317_p9  ;;  %p1324_p4 = por %p1323_p2, %p1322_p13 }
  0x23   : > { %p1320_p12 = pneg %p1319_p11  ;;  %p1326_p5 = por %p1325_p6, %p1324_p4 }
  0x25   : > { %p1327_p3 = pnand %p1326_p5, %p1320_p12 }
  0x27   : > { %1330 = shalt.err (!%p1327_p3)
}
  0x28   : > { %s1331_s27 = scalar_lea.vmem %s1660_s9, 16384  ;;  %s1534_s8 = smov [#allocation6]  }
  0x29   : > { %p1332_p9 = scmp.ne.s32.totalorder %s1660_s9, %s1331_s27  ;;  %s1336_s26 = sshll.u32 %s1534_s8, 4  ;;  %s1337_s26 = int_to_ptr.vmem [resolvable:$false] %s1336_s26 }
  0x2a   : > { %s1338_s30 = scalar_lea.vmem %s1337_s26, 32768  ;;  %p1339_p8 = scmp.lt.s32.totalorder %s1660_s9, %s1337_s26 }
  0x2b   : > { %p1334_p11 = pnand %p1332_p9, %p2143_p10  ;;  %p1340_p13 = scmp.lt.s32.totalorder %s1338_s30, %s1331_s27 }
  0x2d   : > { %p1335_p0 = pneg %p1334_p11  ;;  %p1341_p2 = por %p1340_p13, %p1339_p8 }
  0x2f   : > { %p1342_p4 = pnand %p1341_p2, %p1335_p0 }
  0x31   : > { %1345 = shalt.err (!%p1342_p4)
}
  0x32   : > { %s1535_s25 = smov 1024   ;;  %s1536_s4 = smov 512  }
  0x33   : > { %s1537_s5 = smov 32   ;;  %p219_p0 = scmp.lt.s32.totalorder %s1532_s22, 5 }
  0x34   : > { %1194 = dma.hbm_to_vmem [thread:$0]  (!%p1656_p7), %s1652_s7, 16384, %s1660_s9, %s1663_s11, %s1535_s25, %s1536_s4, %s1537_s5  }
  0x35   : > { %p2162_p3 = scmp.ge.s32.totalorder %s1532_s22, 1  ;;  %s1699_s27 = sadd.s32 4294967295, %s1532_s22  }
  0x36   : > { %s918_s8 = sadd.s32 4294967294, %s1532_s22   ;;  %s34_s26 = sadd.s32 1, %s1528_s21 }
  0x37   : > { %p1694_p5 = pnand %p2162_p3, %p219_p0  ;;  %s41_s30 = sadd.s32 1, %s1512_s17 }
  0x38   : > { %s2201_s26 = smov (!%p1623_p1, %s34_s26), %s1528_s21  ;;  %p48_p8 = scmp.ne.s32.totalorder %s1512_s17, %s1508_s16 }
  0x39   : > { %s2163_s6 = scalar_select %p1694_p5, 1, 0 }
  0x3a   : > { %p54_p12 = scmp.ne.s32.totalorder %s1508_s16, %s1504_s15  ;;  %p36_p6 = scmp.ge.s32.totalorder %s2201_s26, 2 }
  0x3b   : > { %p55_p9 = scmp.eq.s32.totalorder %s1699_s27, 0  ;;  %p2164_p11 = scmp.eq.s32.totalorder %s1532_s22, 0 }
  0x3c   : > { %p130_p2 = scmp.eq.s32.totalorder %s1699_s27, 3  ;;  %s2203_s26 = smov (%p36_p6, %s2201_s26), 0 }
  0x3d   : > { %p1714_p13 = por %p2164_p11, %p48_p8  ;;  %2166 = sst [smem:[#allocation17_spill]] %s2203_s26 }
  0x3e   : > { %p1724_p1 = por %p55_p9, %p54_p12  ;;  %p2168_p4 = scmp.ne.s32.totalorder %s1496_s13, %s1492_s12 }
  0x3f   : > { %s38_s25 = ssub.s32 %s1528_s21, %s2203_s26  ;;  %p1737_p3 = por %p130_p2, %p48_p8 }
  0x40   : > { %s2167_s24 = scalar_select %p1724_p1, 1, 0 }
  0x41   : > { %p1731_p0 = por %p2168_p4, %p55_p9  ;;  %p39_p11 = scmp.eq.s32.totalorder %s38_s25, 0 }
  0x42   : > { %s2170_s4 = scalar_select %p1737_p3, 1, 0 }
  0x43   : > { %s2169_s9 = scalar_select %p1731_p0, 1, 0 }
  0x44   : > { %p136_p6 = scmp.eq.s32.totalorder %s918_s8, 3  ;;  %s156_s5 = sand.u32 1, %s1512_s17  }
  0x45   : > { %s950_s28 = sshll.u32 %s1528_s21, 9  ;;  %s921_s12 = sshll.u32 %s156_s5, 5 }
  0x46   : > { %s1744_s1 = scalar_select %p39_p11, %s1512_s17, %s41_s30  }
  0x47   : > { %p1749_p10 = por %p136_p6, %p54_p12  ;;  %s2173_s0 = sld [smem:[#allocation19_spill]] }
  0x48   : > { %2171 = sst [smem:[#allocation18_spill]] %s1744_s1  ;;  %p2174_p8 = scmp.lt.s32.totalorder %s1532_s22, 4 }
  0x49   : > { %s2172_s23 = scalar_select %p1749_p10, 1, 0 }
  0x4a   : > { %p1762_p9 = pnand %p2174_p8, %p1714_p13  ;;  %s160_s30 = scalar_lea.vmem [#allocation3], %s921_s12 }
  0x4b   : > { %s168_s25 = sshll.u32 %s160_s30, 4  ;;  %s2176_s21 = sand.u32 1, %s1500_s14   ;;  %s1766_s25 = int_to_ptr.vmem [resolvable:$true] %s168_s25 }
  0x4c   : > { %s1770_s3 = sshll.u32 %s2176_s21, 9  ;;  %p1348_p2 = pneg %p1762_p9 }
  0x4d   : > { %s1756_s26 = scalar_lea.hbm %s2173_s0, %s950_s28  ;;  %s1772_s28 = scalar_lea.sflag [#allocation4], %s156_s5 }
  0x4e   : > { %s1346_s29 = scalar_lea.hbm %s1756_s26, 512  ;;  %s1351_s12 = scalar_lea.hbm %s2173_s0, 1024 }
  0x4f   : > { %p1347_p12 = scmp.ne.s32.totalorder %s1756_s26, %s1346_s29  ;;  %p1352_p11 = scmp.lt.u32.totalorder %s1756_s26, %s2173_s0 }
  0x50   : > { %p1353_p6 = scmp.lt.u32.totalorder %s1351_s12, %s1346_s29  ;;  %p1355_p10 = scmp.lt.u32.totalorder %s1346_s29, %s1756_s26 }
  0x51   : > { %p1349_p13 = pnand %p1348_p2, %p1347_p12 }
  0x52   : > { %p1354_p8 = por %p1353_p6, %p1352_p11 }
  0x53   : > { %p1350_p4 = pneg %p1349_p13 }
  0x54   : > { %p1356_p3 = por %p1355_p10, %p1354_p8 }
  0x56   : > { %p1357_p0 = pnand %p1356_p3, %p1350_p4 }
  0x58   : > { %1360 = shalt.err (!%p1357_p0)
}
  0x59   : > { %s1361_s21 = scalar_lea.vmem %s1766_s25, 512  ;;  %s1538_s1 = smov [#allocation3]  }
  0x5a   : > { %p1362_p12 = scmp.ne.s32.totalorder %s1766_s25, %s1361_s21  ;;  %s1366_s5 = sshll.u32 %s1538_s1, 4  ;;  %s1367_s5 = int_to_ptr.vmem [resolvable:$false] %s1366_s5 }
  0x5b   : > { %s1368_s17 = scalar_lea.vmem %s1367_s5, 1024  ;;  %p1369_p5 = scmp.lt.s32.totalorder %s1766_s25, %s1367_s5 }
  0x5c   : > { %p1364_p13 = pnand %p1362_p12, %p1348_p2  ;;  %p1370_p11 = scmp.lt.s32.totalorder %s1368_s17, %s1361_s21 }
  0x5e   : > { %p1365_p1 = pneg %p1364_p13  ;;  %p1371_p6 = por %p1370_p11, %p1369_p5 }
  0x60   : > { %p1372_p10 = pnand %p1371_p6, %p1365_p1 }
  0x62   : > { %1375 = shalt.err (!%p1372_p10)
}
  0x63   : > { %s1539_s29 = smov 256   ;;  %s1540_s7 = smov 16  }
  0x64   : > { %1191 = dma.hbm_to_vmem [thread:$0]  (!%p1762_p9), %s1756_s26, 512, %s1766_s25, %s1772_s28, %s1539_s29, %s1539_s29, %s1540_s7  }
  0x65   : > { %s953_s12 = sshll.u32 %s1524_s20, 13  ;;  %s203_s5 = scalar_lea.vmem [#allocation8], %s1770_s3 }
  0x66   : > { %s1807_s1 = scalar_lea.hbm %s2138_s2, %s953_s12  ;;  %s211_s17 = sshll.u32 %s203_s5, 4  ;;  %s1810_s17 = int_to_ptr.vmem [resolvable:$true] %s211_s17 }
  0x67   : > { %s1376_s0 = scalar_lea.hbm %s1807_s1, 8192  ;;  %p2177_p1 = pneg %p1656_p7 }
  0x68   : > { %p1377_p5 = scmp.ne.s32.totalorder %s1807_s1, %s1376_s0  ;;  %s1381_s25 = scalar_lea.hbm %s2138_s2, 16384 }
  0x69   : > { %p1382_p9 = scmp.lt.u32.totalorder %s1807_s1, %s2138_s2  ;;  %p1383_p2 = scmp.lt.u32.totalorder %s1381_s25, %s1376_s0 }
  0x6a   : > { %p1379_p0 = pnand %p1377_p5, %p2177_p1  ;;  %p1385_p8 = scmp.lt.u32.totalorder %s1376_s0, %s1807_s1 }
  0x6b   : > { %p1384_p4 = por %p1383_p2, %p1382_p9 }
  0x6c   : > { %p1380_p3 = pneg %p1379_p0 }
  0x6d   : > { %p1386_p12 = por %p1385_p8, %p1384_p4 }
  0x6f   : > { %p1387_p13 = pnand %p1386_p12, %p1380_p3 }
  0x71   : > { %1390 = shalt.err (!%p1387_p13)
}
  0x72   : > { %s1391_s3 = scalar_lea.vmem %s1810_s17, 8192  ;;  %p2178_p6 = pmov %p2177_p1 }
  0x73   : > { %p1392_p11 = scmp.ne.s32.totalorder %s1810_s17, %s1391_s3  ;;  %s1541_s30 = smov [#allocation8]  }
  0x74   : > { %s1396_s21 = sshll.u32 %s1541_s30, 4  ;;  %s1397_s21 = int_to_ptr.vmem [resolvable:$false] %s1396_s21 }
  0x75   : > { %p1394_p10 = pnand %p1392_p11, %p2178_p6  ;;  %s1398_s5 = scalar_lea.vmem %s1397_s21, 16384 }
  0x76   : > { %p1399_p1 = scmp.lt.s32.totalorder %s1810_s17, %s1397_s21  ;;  %p1400_p0 = scmp.lt.s32.totalorder %s1398_s5, %s1391_s3 }
  0x77   : > { %p1395_p5 = pneg %p1394_p10 }
  0x78   : > { %p1401_p9 = por %p1400_p0, %p1399_p1 }
  0x7a   : > { %p1402_p2 = pnand %p1401_p9, %p1395_p5 }
  0x7c   : > { %1405 = shalt.err (!%p1402_p2)
}
  0x7d   : > { %1197 = dma.hbm_to_vmem [thread:$0]  (!%p1656_p7), %s1807_s1, 8192, %s1810_s17, %s1663_s11, %s1539_s29, %s1539_s29, %s1540_s7  }
  0x7e   : > { %p2179_p3 = scmp.ne.s32.totalorder %s2163_s6, 0 }
  0x7f   : > { %s1842_s0 = sand.u32 (!%p2179_p3), 1, %s1508_s16   ;;  %p2180_p4 = scmp.ne.s32.totalorder (!%p2179_p3), %s2167_s24, 0 }
  0x80   : > { %223 = sbr.rel (%p2179_p3) target bundleno = 718 (0x2ce), region = 32  ;;  %s933_s26 = sshll.u32 (!%p2179_p3), %s1842_s0, 5 }
  0x81   : > { %s226_s8 = scalar_lea.sflag (!%p2179_p3), [#allocation4], %s1842_s0  ;;  %s1846_s25 = scalar_lea.vmem (!%p2179_p3), [#allocation3], %s933_s26 }
  0x87   : > { %1479 = dma.done.wait (%p2180_p4), %s226_s8, 512  }
  0x88   : > { %1481 = vsyncadd (%p2180_p4), %s226_s8, 4294966784  ;;  %s234_s10 = sand.u32 1, %s1699_s27   ;;  %s236_s11 = sand.u32 1, %s1496_s13  }
  0x89   : > { %s934_s6 = sshll.u32 %s236_s11, 10  ;;  %s235_s29 = scalar_lea.sflag [#allocation7], %s234_s10 }
  0x8a   : > { %s1854_s7 = scalar_lea.vmem [#allocation6], %s934_s6  ;;  %p2181_p7 = scmp.ne.s32.totalorder %s2169_s9, 0 }
  0x8c   : > { %1483 = dma.done.wait (%p2181_p7), %s235_s29, 24576  }
  0x8d   : > { %1485 = vsyncadd (%p2181_p7), %s235_s29, 4294942720  ;;  %s935_s1 = sshll.u32 %s236_s11, 9  ;;  %s1862_s28 = scalar_lea.vmem [#allocation9], %s933_s26 }
  0x8e   : > { %s1860_s17 = scalar_lea.vmem [#allocation8], %s935_s1  ;;  %p937_p8 = scmp.ne.s32.totalorder %s1516_s18, 0 }
  0x8f   : > { %v1542_v0 = vmov (!%p937_p8), 0.0  }
  0x90   : > { %287 = sbr.rel (%p937_p8) target bundleno = 151 (0x97), region = 48  ;;  %288 = vst [vmem:[#allocation2] sm:$0xff] (!%p937_p8), %v1542_v0  ;;  %289 = vst [vmem:[#allocation2 + $0x8] sm:$0xff] (!%p937_p8), %v1542_v0 }
  0x91   : > { %290 = vst [vmem:[#allocation2 + $0x10] sm:$0xff] (!%p937_p8), %v1542_v0  ;;  %291 = vst [vmem:[#allocation2 + $0x18] sm:$0xff] (!%p937_p8), %v1542_v0 }
  0x97 PF: > { %v297_v1 = vld [vmem:[%s1854_s7 + $0x8] sm:$0xff]  ;;  %v296_v3 = vld [vmem:[%s1854_s7] sm:$0xff]  ;;  %v299_v24 = vld [vmem:[%s1854_s7 + $0x18] sm:$0xff]  ;;  %p942_p12 = scmp.ne.s32.totalorder %s1516_s18, 1 }
  0x98   : > { %v301_v2 = vld [vmem:[%s1854_s7 + $0x28] sm:$0xff]  ;;  %v300_v5 = vld [vmem:[%s1854_s7 + $0x20] sm:$0xff]  ;;  %v303_v25 = vld [vmem:[%s1854_s7 + $0x38] sm:$0xff] }
  0x99   : > { %v956_v4 = vpack.c.bf16 %v301_v2, %v297_v1  ;;  %v305_v6 = vld [vmem:[%s1854_s7 + $0x48] sm:$0xff]  ;;  %v958_v8 = vpack.c.bf16 %v300_v5, %v296_v3  ;;  %v304_v10 = vld [vmem:[%s1854_s7 + $0x40] sm:$0xff]  ;;  %v1020_v28 = vpack.c.bf16 %v303_v25, %v299_v24  ;;  %v298_v29 = vld [vmem:[%s1854_s7 + $0x10] sm:$0xff] }
  0x9a   : > { %v309_v7 = vld [vmem:[%s1854_s7 + $0x68] sm:$0xff]  ;;  %v308_v11 = vld [vmem:[%s1854_s7 + $0x60] sm:$0xff]  ;;  %v302_v30 = vld [vmem:[%s1854_s7 + $0x30] sm:$0xff] }
  0x9b   : > { %v960_v9 = vpack.c.bf16 %v309_v7, %v305_v6  ;;  %v313_v12 = vld [vmem:[%s1854_s7 + $0x88] sm:$0xff]  ;;  %957 = vmatprep.subr.bf16.mxu0 %v956_v4  ;;  %v962_v14 = vpack.c.bf16 %v308_v11, %v304_v10  ;;  %v312_v16 = vld [vmem:[%s1854_s7 + $0x80] sm:$0xff]  ;;  %1021 = vmatprep.subr.bf16.mxu1 %v1020_v28  ;;  %v1022_v33 = vpack.c.bf16 %v302_v30, %v298_v29  ;;  %v307_v34 = vld [vmem:[%s1854_s7 + $0x58] sm:$0xff] }
  0x9c   : > { %v317_v13 = vld [vmem:[%s1854_s7 + $0xa8] sm:$0xff]  ;;  %959 = vmatpush1.bf16.msra.mxu0 %v958_v8  ;;  %v316_v17 = vld [vmem:[%s1854_s7 + $0xa0] sm:$0xff]  ;;  %v311_v35 = vld [vmem:[%s1854_s7 + $0x78] sm:$0xff] }
  0x9d   : > { %961 = vmatprep.subr.bf16.mxu0 %v960_v9  ;;  %v964_v15 = vpack.c.bf16 %v317_v13, %v313_v12  ;;  %v321_v18 = vld [vmem:[%s1854_s7 + $0xc8] sm:$0xff]  ;;  %v966_v20 = vpack.c.bf16 %v316_v17, %v312_v16  ;;  %v320_v21 = vld [vmem:[%s1854_s7 + $0xc0] sm:$0xff]  ;;  %v1024_v38 = vpack.c.bf16 %v311_v35, %v307_v34  ;;  %v306_v39 = vld [vmem:[%s1854_s7 + $0x50] sm:$0xff]  ;;  %1023 = vmatpush1.bf16.msra.mxu1 %v1022_v33 }
  0x9e   : > { %v325_v19 = vld [vmem:[%s1854_s7 + $0xe8] sm:$0xff]  ;;  %v324_v23 = vld [vmem:[%s1854_s7 + $0xe0] sm:$0xff]  ;;  %v310_v40 = vld [vmem:[%s1854_s7 + $0x70] sm:$0xff] }
  0x9f   : > { %v968_v22 = vpack.c.bf16 %v325_v19, %v321_v18  ;;  %v329_v26 = vld [vmem:[%s1854_s7 + $0x108] sm:$0xff]  ;;  %v970_v31 = vpack.c.bf16 %v324_v23, %v320_v21  ;;  %v328_v32 = vld [vmem:[%s1854_s7 + $0x100] sm:$0xff]  ;;  %v1026_v43 = vpack.c.bf16 %v310_v40, %v306_v39  ;;  %v315_v44 = vld [vmem:[%s1854_s7 + $0x98] sm:$0xff]  ;;  %1025 = vmatprep.subr.bf16.mxu1 %v1024_v38 }
  0xa0   : > { %963 = vmatpush1.bf16.msra.mxu0 %v962_v14  ;;  %v333_v27 = vld [vmem:[%s1854_s7 + $0x128] sm:$0xff]  ;;  %v332_v37 = vld [vmem:[%s1854_s7 + $0x120] sm:$0xff]  ;;  %v319_v45 = vld [vmem:[%s1854_s7 + $0xb8] sm:$0xff] }
  0xa1   : > { %965 = vmatprep.subr.bf16.mxu0 %v964_v15  ;;  %v972_v36 = vpack.c.bf16 %v333_v27, %v329_v26  ;;  %v337_v41 = vld [vmem:[%s1854_s7 + $0x148] sm:$0xff]  ;;  %v974_v46 = vpack.c.bf16 %v332_v37, %v328_v32  ;;  %v336_v47 = vld [vmem:[%s1854_s7 + $0x140] sm:$0xff]  ;;  %v1028_v48 = vpack.c.bf16 %v319_v45, %v315_v44  ;;  %v314_v49 = vld [vmem:[%s1854_s7 + $0x90] sm:$0xff]  ;;  %1027 = vmatpush1.bf16.msra.mxu1 %v1026_v43 }
  0xa2   : > { %v341_v42 = vld [vmem:[%s1854_s7 + $0x168] sm:$0xff]  ;;  %v318_v50 = vld [vmem:[%s1854_s7 + $0xb0] sm:$0xff]  ;;  %v340_v52 = vld [vmem:[%s1854_s7 + $0x160] sm:$0xff] }
  0xa3   : > { %v976_v51 = vpack.c.bf16 %v341_v42, %v337_v41  ;;  %v323_v53 = vld [vmem:[%s1854_s7 + $0xd8] sm:$0xff]  ;;  %v345_v55 = vld [vmem:[%s1854_s7 + $0x188] sm:$0xff]  ;;  %v1030_v57 = vpack.c.bf16 %v318_v50, %v314_v49  ;;  %1029 = vmatprep.subr.bf16.mxu1 %v1028_v48  ;;  %v322_v59 = vld [vmem:[%s1854_s7 + $0xd0] sm:$0xff]  ;;  %v978_v61 = vpack.c.bf16 %v340_v52, %v336_v47 }
  0xa4   : > { %967 = vmatpush1.bf16.msra.mxu0 %v966_v20  ;;  %v327_v54 = vld [vmem:[%s1854_s7 + $0xf8] sm:$0xff]  ;;  %v349_v56 = vld [vmem:[%s1854_s7 + $0x1a8] sm:$0xff]  ;;  %v326_v60 = vld [vmem:[%s1854_s7 + $0xf0] sm:$0xff] }
  0xa5   : > { %969 = vmatprep.subr.bf16.mxu0 %v968_v22  ;;  %v1032_v58 = vpack.c.bf16 %v327_v54, %v323_v53  ;;  %v331_v62 = vld [vmem:[%s1854_s7 + $0x118] sm:$0xff]  ;;  %v980_v0 = vpack.c.bf16 %v349_v56, %v345_v55  ;;  %v344_v1 = vld [vmem:[%s1854_s7 + $0x180] sm:$0xff]  ;;  %v353_v3 = vld [vmem:[%s1854_s7 + $0x1c8] sm:$0xff]  ;;  %1031 = vmatpush1.bf16.msra.mxu1 %v1030_v57  ;;  %v1034_v5 = vpack.c.bf16 %v326_v60, %v322_v59 }
  0xa6   : > { %v335_v63 = vld [vmem:[%s1854_s7 + $0x138] sm:$0xff]  ;;  %v348_v2 = vld [vmem:[%s1854_s7 + $0x1a0] sm:$0xff]  ;;  %v357_v4 = vld [vmem:[%s1854_s7 + $0x1e8] sm:$0xff] }
  0xa7   : > { %1033 = vmatprep.subr.bf16.mxu1 %v1032_v58  ;;  %v1036_v6 = vpack.c.bf16 %v335_v63, %v331_v62  ;;  %v330_v7 = vld [vmem:[%s1854_s7 + $0x110] sm:$0xff]  ;;  %v982_v9 = vpack.c.bf16 %v348_v2, %v344_v1  ;;  %v339_v10 = vld [vmem:[%s1854_s7 + $0x158] sm:$0xff]  ;;  %v984_v12 = vpack.c.bf16 %v357_v4, %v353_v3  ;;  %v352_v13 = vld [vmem:[%s1854_s7 + $0x1c0] sm:$0xff] }
  0xa8   : > { %971 = vmatpush1.bf16.msra.mxu0 %v970_v31  ;;  %v334_v8 = vld [vmem:[%s1854_s7 + $0x130] sm:$0xff]  ;;  %v343_v11 = vld [vmem:[%s1854_s7 + $0x178] sm:$0xff]  ;;  %v356_v14 = vld [vmem:[%s1854_s7 + $0x1e0] sm:$0xff] }
  0xa9   : > { %973 = vmatprep.subr.bf16.mxu0 %v972_v36  ;;  %v361_v15 = vld [vmem:[%s1854_s7 + $0x208] sm:$0xff]  ;;  %1035 = vmatpush1.bf16.msra.mxu1 %v1034_v5  ;;  %v1038_v17 = vpack.c.bf16 %v334_v8, %v330_v7  ;;  %v1040_v18 = vpack.c.bf16 %v343_v11, %v339_v10  ;;  %v338_v19 = vld [vmem:[%s1854_s7 + $0x150] sm:$0xff]  ;;  %v986_v21 = vpack.c.bf16 %v356_v14, %v352_v13  ;;  %v347_v22 = vld [vmem:[%s1854_s7 + $0x198] sm:$0xff] }
  0xaa   : > { %v365_v16 = vld [vmem:[%s1854_s7 + $0x228] sm:$0xff]  ;;  %1037 = vmatprep.subr.bf16.mxu1 %v1036_v6  ;;  %v342_v20 = vld [vmem:[%s1854_s7 + $0x170] sm:$0xff]  ;;  %v351_v23 = vld [vmem:[%s1854_s7 + $0x1b8] sm:$0xff] }
  0xab   : > { %v988_v24 = vpack.c.bf16 %v365_v16, %v361_v15  ;;  %v360_v25 = vld [vmem:[%s1854_s7 + $0x200] sm:$0xff]  ;;  %v369_v27 = vld [vmem:[%s1854_s7 + $0x248] sm:$0xff]  ;;  %v1042_v29 = vpack.c.bf16 %v342_v20, %v338_v19  ;;  %v1044_v30 = vpack.c.bf16 %v351_v23, %v347_v22  ;;  %v346_v31 = vld [vmem:[%s1854_s7 + $0x190] sm:$0xff] }
  0xac   : > { %975 = vmatpush1.bf16.msra.mxu0 %v974_v46  ;;  %v364_v26 = vld [vmem:[%s1854_s7 + $0x220] sm:$0xff]  ;;  %v373_v28 = vld [vmem:[%s1854_s7 + $0x268] sm:$0xff]  ;;  %v350_v32 = vld [vmem:[%s1854_s7 + $0x1b0] sm:$0xff] }
  0xad   : > { %977 = vmatprep.subr.bf16.mxu0 %v976_v51  ;;  %1039 = vmatpush1.bf16.msra.mxu1 %v1038_v17  ;;  %v990_v33 = vpack.c.bf16 %v364_v26, %v360_v25  ;;  %v355_v34 = vld [vmem:[%s1854_s7 + $0x1d8] sm:$0xff]  ;;  %v992_v36 = vpack.c.bf16 %v373_v28, %v369_v27  ;;  %v368_v37 = vld [vmem:[%s1854_s7 + $0x240] sm:$0xff]  ;;  %v293_v39 = vld [vmem:[%s1846_s25 + $0x8] sm:$0xff]  ;;  %v1046_v42 = vpack.c.bf16 %v350_v32, %v346_v31 }
  0xae   : > { %1041 = vmatprep.subr.bf16.mxu1 %v1040_v18  ;;  %v359_v35 = vld [vmem:[%s1854_s7 + $0x1f8] sm:$0xff]  ;;  %v372_v38 = vld [vmem:[%s1854_s7 + $0x260] sm:$0xff]  ;;  %v377_v40 = vld [vmem:[%s1854_s7 + $0x288] sm:$0xff]  ;;  %488 = vmatprep.mubr.f32.mxu0 %v293_v39 }
  0xaf   : > { %v381_v41 = vld [vmem:[%s1854_s7 + $0x2a8] sm:$0xff]  ;;  %v1048_v43 = vpack.c.bf16 %v359_v35, %v355_v34  ;;  %v354_v44 = vld [vmem:[%s1854_s7 + $0x1d0] sm:$0xff]  ;;  %565 = vmatprep.mubr.f32.mxu1 %v293_v39  ;;  %v994_v46 = vpack.c.bf16 %v372_v38, %v368_v37  ;;  %v363_v47 = vld [vmem:[%s1854_s7 + $0x218] sm:$0xff] }
  0xb0   : > { %979 = vmatpush1.bf16.msra.mxu0 %v978_v61  ;;  %v358_v45 = vld [vmem:[%s1854_s7 + $0x1f0] sm:$0xff]  ;;  %v367_v48 = vld [vmem:[%s1854_s7 + $0x238] sm:$0xff]  ;;  %v996_v49 = vpack.c.bf16 %v381_v41, %v377_v40  ;;  %v376_v50 = vld [vmem:[%s1854_s7 + $0x280] sm:$0xff] }
  0xb1   : > { %981 = vmatprep.subr.bf16.mxu0 %v980_v0  ;;  %1043 = vmatpush1.bf16.msra.mxu1 %v1042_v29  ;;  %v380_v51 = vld [vmem:[%s1854_s7 + $0x2a0] sm:$0xff]  ;;  %v385_v52 = vld [vmem:[%s1854_s7 + $0x2c8] sm:$0xff]  ;;  %v1050_v54 = vpack.c.bf16 %v358_v45, %v354_v44  ;;  %v1052_v55 = vpack.c.bf16 %v367_v48, %v363_v47  ;;  %v362_v56 = vld [vmem:[%s1854_s7 + $0x210] sm:$0xff] }
  0xb2   : > { %1045 = vmatprep.subr.bf16.mxu1 %v1044_v30  ;;  %v389_v53 = vld [vmem:[%s1854_s7 + $0x2e8] sm:$0xff]  ;;  %v366_v57 = vld [vmem:[%s1854_s7 + $0x230] sm:$0xff]  ;;  %v998_v58 = vpack.c.bf16 %v380_v51, %v376_v50  ;;  %v371_v59 = vld [vmem:[%s1854_s7 + $0x258] sm:$0xff] }
  0xb3   : > { %v375_v60 = vld [vmem:[%s1854_s7 + $0x278] sm:$0xff]  ;;  %v1000_v61 = vpack.c.bf16 %v389_v53, %v385_v52  ;;  %v384_v62 = vld [vmem:[%s1854_s7 + $0x2c0] sm:$0xff]  ;;  %v393_v0 = vld [vmem:[%s1854_s7 + $0x308] sm:$0xff]  ;;  %v1054_v2 = vpack.c.bf16 %v366_v57, %v362_v56 }
  0xb4   : > { %983 = vmatpush1.bf16.msra.mxu0 %v982_v9  ;;  %v388_v63 = vld [vmem:[%s1854_s7 + $0x2e0] sm:$0xff]  ;;  %v397_v1 = vld [vmem:[%s1854_s7 + $0x328] sm:$0xff]  ;;  %v1056_v3 = vpack.c.bf16 %v375_v60, %v371_v59  ;;  %v370_v4 = vld [vmem:[%s1854_s7 + $0x250] sm:$0xff] }
  0xb5   : > { %985 = vmatprep.subr.bf16.mxu0 %v984_v12  ;;  %1047 = vmatpush1.bf16.msra.mxu1 %v1046_v42  ;;  %v374_v5 = vld [vmem:[%s1854_s7 + $0x270] sm:$0xff]  ;;  %v1002_v6 = vpack.c.bf16 %v388_v63, %v384_v62  ;;  %v379_v7 = vld [vmem:[%s1854_s7 + $0x298] sm:$0xff]  ;;  %v1004_v9 = vpack.c.bf16 %v397_v1, %v393_v0  ;;  %v392_v10 = vld [vmem:[%s1854_s7 + $0x300] sm:$0xff] }
  0xb6   : > { %1049 = vmatprep.subr.bf16.mxu1 %v1048_v43  ;;  %v383_v8 = vld [vmem:[%s1854_s7 + $0x2b8] sm:$0xff]  ;;  %v396_v11 = vld [vmem:[%s1854_s7 + $0x320] sm:$0xff]  ;;  %v401_v12 = vld [vmem:[%s1854_s7 + $0x348] sm:$0xff]  ;;  %v1058_v14 = vpack.c.bf16 %v374_v5, %v370_v4 }
  0xb7   : > { %v405_v13 = vld [vmem:[%s1854_s7 + $0x368] sm:$0xff]  ;;  %v1060_v15 = vpack.c.bf16 %v383_v8, %v379_v7  ;;  %v378_v16 = vld [vmem:[%s1854_s7 + $0x290] sm:$0xff]  ;;  %v1006_v18 = vpack.c.bf16 %v396_v11, %v392_v10  ;;  %v387_v19 = vld [vmem:[%s1854_s7 + $0x2d8] sm:$0xff] }
  0xb8   : > { %987 = vmatpush1.bf16.msra.mxu0 %v986_v21  ;;  %v382_v17 = vld [vmem:[%s1854_s7 + $0x2b0] sm:$0xff]  ;;  %v391_v20 = vld [vmem:[%s1854_s7 + $0x2f8] sm:$0xff]  ;;  %v1008_v21 = vpack.c.bf16 %v405_v13, %v401_v12  ;;  %v400_v22 = vld [vmem:[%s1854_s7 + $0x340] sm:$0xff] }
  0xb9   : > { %989 = vmatprep.subr.bf16.mxu0 %v988_v24  ;;  %1051 = vmatpush1.bf16.msra.mxu1 %v1050_v54  ;;  %v404_v23 = vld [vmem:[%s1854_s7 + $0x360] sm:$0xff]  ;;  %v409_v24 = vld [vmem:[%s1854_s7 + $0x388] sm:$0xff]  ;;  %v1062_v26 = vpack.c.bf16 %v382_v17, %v378_v16  ;;  %v1064_v27 = vpack.c.bf16 %v391_v20, %v387_v19  ;;  %v386_v28 = vld [vmem:[%s1854_s7 + $0x2d0] sm:$0xff] }
  0xba   : > { %1053 = vmatprep.subr.bf16.mxu1 %v1052_v55  ;;  %v413_v25 = vld [vmem:[%s1854_s7 + $0x3a8] sm:$0xff]  ;;  %v390_v29 = vld [vmem:[%s1854_s7 + $0x2f0] sm:$0xff]  ;;  %v1010_v30 = vpack.c.bf16 %v404_v23, %v400_v22  ;;  %v395_v31 = vld [vmem:[%s1854_s7 + $0x318] sm:$0xff] }
  0xbb   : > { %v399_v32 = vld [vmem:[%s1854_s7 + $0x338] sm:$0xff]  ;;  %v408_v34 = vld [vmem:[%s1854_s7 + $0x380] sm:$0xff]  ;;  %v421_v37 = vld [vmem:[%s1854_s7 + $0x3e8] sm:$0xff]  ;;  %v1066_v38 = vpack.c.bf16 %v390_v29, %v386_v28 }
  0xbc   : > { %991 = vmatpush1.bf16.msra.mxu0 %v990_v33  ;;  %v1012_v33 = vpack.c.bf16 %v413_v25, %v409_v24  ;;  %v412_v35 = vld [vmem:[%s1854_s7 + $0x3a0] sm:$0xff]  ;;  %v1068_v39 = vpack.c.bf16 %v399_v32, %v395_v31  ;;  %v394_v40 = vld [vmem:[%s1854_s7 + $0x310] sm:$0xff]  ;;  %v403_v43 = vld [vmem:[%s1854_s7 + $0x358] sm:$0xff] }
  0xbd   : > { %993 = vmatprep.subr.bf16.mxu0 %v992_v36  ;;  %1055 = vmatpush1.bf16.msra.mxu1 %v1054_v2  ;;  %v417_v36 = vld [vmem:[%s1854_s7 + $0x3c8] sm:$0xff]  ;;  %v398_v41 = vld [vmem:[%s1854_s7 + $0x330] sm:$0xff]  ;;  %v1014_v42 = vpack.c.bf16 %v412_v35, %v408_v34  ;;  %v407_v44 = vld [vmem:[%s1854_s7 + $0x378] sm:$0xff] }
  0xbe   : > { %1057 = vmatprep.subr.bf16.mxu1 %v1056_v3  ;;  %v1016_v45 = vpack.c.bf16 %v421_v37, %v417_v36  ;;  %v420_v47 = vld [vmem:[%s1854_s7 + $0x3e0] sm:$0xff]  ;;  %v1070_v48 = vpack.c.bf16 %v398_v41, %v394_v40  ;;  %v617_v50 = vld [vmem:[%s1860_s17 + $0x18] sm:$0xff]  ;;  %v1072_v51 = vpack.c.bf16 %v407_v44, %v403_v43  ;;  %v402_v52 = vld [vmem:[%s1854_s7 + $0x350] sm:$0xff] }
  0xbf   : > { %v406_v53 = vld [vmem:[%s1854_s7 + $0x370] sm:$0xff]  ;;  %v411_v55 = vld [vmem:[%s1854_s7 + $0x398] sm:$0xff]  ;;  %v292_v2 = vld [vmem:[%s1846_s25] sm:$0xff] }
  0xc0   : > { %995 = vmatpush1.bf16.msra.mxu0 %v994_v46  ;;  %v416_v46 = vld [vmem:[%s1854_s7 + $0x3c0] sm:$0xff]  ;;  %v415_v56 = vld [vmem:[%s1854_s7 + $0x3b8] sm:$0xff]  ;;  %v616_v59 = vld [vmem:[%s1860_s17 + $0x10] sm:$0xff]  ;;  %v1074_v60 = vpack.c.bf16 %v406_v53, %v402_v52 }
  0xc1   : > { %997 = vmatprep.subr.bf16.mxu0 %v996_v49  ;;  %1059 = vmatpush1.bf16.msra.mxu1 %v1058_v14  ;;  %v615_v49 = vld [vmem:[%s1860_s17 + $0x8] sm:$0xff]  ;;  %v1018_v54 = vpack.c.bf16 %v420_v47, %v416_v46  ;;  %v621_v62 = vld [vmem:[%s1860_s17 + $0x38] sm:$0xff]  ;;  %v1076_v63 = vpack.c.bf16 %v415_v56, %v411_v55  ;;  %v410_v0 = vld [vmem:[%s1854_s7 + $0x390] sm:$0xff] }
  0xc2   : > { %1061 = vmatprep.subr.bf16.mxu1 %v1060_v15  ;;  %v1084_v57 = vpack.c.bf16 %v617_v50, %v615_v49  ;;  %v414_v1 = vld [vmem:[%s1854_s7 + $0x3b0] sm:$0xff]  ;;  %v419_v3 = vld [vmem:[%s1854_s7 + $0x3d8] sm:$0xff]  ;;  %v618_v8 = vld [vmem:[%s1860_s17 + $0x20] sm:$0xff] }
  0xc3   : > { %v423_v4 = vld [vmem:[%s1854_s7 + $0x3f8] sm:$0xff]  ;;  %v1078_v10 = vpack.c.bf16 %v414_v1, %v410_v0  ;;  %v623_v11 = vld [vmem:[%s1860_s17 + $0x48] sm:$0xff]  ;;  %v418_v14 = vld [vmem:[%s1854_s7 + $0x3d0] sm:$0xff] }
  0xc4   : > { %999 = vmatpush1.bf16.msra.mxu0 %v998_v58  ;;  %v614_v58 = vld [vmem:[%s1860_s17] sm:$0xff]  ;;  %v625_v12 = vld [vmem:[%s1860_s17 + $0x58] sm:$0xff]  ;;  %v1080_v13 = vpack.c.bf16 %v423_v4, %v419_v3  ;;  %v422_v15 = vld [vmem:[%s1854_s7 + $0x3f0] sm:$0xff] }
  0xc5   : > { %1001 = vmatprep.subr.bf16.mxu0 %v1000_v61  ;;  %1063 = vmatpush1.bf16.msra.mxu1 %v1062_v26  ;;  %v619_v61 = vld [vmem:[%s1860_s17 + $0x28] sm:$0xff]  ;;  %v1086_v5 = vpack.c.bf16 %v616_v59, %v614_v58  ;;  %v294_v16 = vld [vmem:[%s1846_s25 + $0x10] sm:$0xff]  ;;  %v622_v19 = vld [vmem:[%s1860_s17 + $0x40] sm:$0xff] }
  0xc6   : > { %1065 = vmatprep.subr.bf16.mxu1 %v1064_v27  ;;  %v1088_v7 = vpack.c.bf16 %v621_v62, %v619_v61  ;;  %v624_v20 = vld [vmem:[%s1860_s17 + $0x50] sm:$0xff]  ;;  %v627_v22 = vld [vmem:[%s1860_s17 + $0x68] sm:$0xff]  ;;  %v629_v23 = vld [vmem:[%s1860_s17 + $0x78] sm:$0xff] }
  0xc7   : > { %v1094_v24 = vpack.c.bf16 %v624_v20, %v622_v19  ;;  %v1096_v25 = vpack.c.bf16 %v629_v23, %v627_v22  ;;  %v626_v26 = vld [vmem:[%s1860_s17 + $0x60] sm:$0xff]  ;;  %v628_v27 = vld [vmem:[%s1860_s17 + $0x70] sm:$0xff]  ;;  %v631_v28 = vld [vmem:[%s1860_s17 + $0x88] sm:$0xff] }
  0xc8   : > { %1003 = vmatpush1.bf16.msra.mxu0 %v1002_v6  ;;  %v295_v6 = vld [vmem:[%s1846_s25 + $0x18] sm:$0xff]  ;;  %v630_v32 = vld [vmem:[%s1860_s17 + $0x80] sm:$0xff]  ;;  %v635_v34 = vld [vmem:[%s1860_s17 + $0xa8] sm:$0xff] }
  0xc9   : > { %1005 = vmatprep.subr.bf16.mxu0 %v1004_v9  ;;  %1067 = vmatpush1.bf16.msra.mxu1 %v1066_v38  ;;  %v620_v9 = vld [vmem:[%s1860_s17 + $0x30] sm:$0xff]  ;;  %v633_v29 = vld [vmem:[%s1860_s17 + $0x98] sm:$0xff]  ;;  %v634_v38 = vld [vmem:[%s1860_s17 + $0xa0] sm:$0xff] }
  0xca   : > { %1069 = vmatprep.subr.bf16.mxu1 %v1068_v39  ;;  %v1090_v17 = vpack.c.bf16 %v620_v9, %v618_v8  ;;  %v1100_v31 = vpack.c.bf16 %v633_v29, %v631_v28  ;;  %v637_v35 = vld [vmem:[%s1860_s17 + $0xb8] sm:$0xff]  ;;  %v636_v39 = vld [vmem:[%s1860_s17 + $0xb0] sm:$0xff]  ;;  %v639_v40 = vld [vmem:[%s1860_s17 + $0xc8] sm:$0xff] }
  0xcb   : > { %v1104_v37 = vpack.c.bf16 %v637_v35, %v635_v34  ;;  %v641_v41 = vld [vmem:[%s1860_s17 + $0xd8] sm:$0xff]  ;;  %v638_v44 = vld [vmem:[%s1860_s17 + $0xc0] sm:$0xff]  ;;  %v643_v46 = vld [vmem:[%s1860_s17 + $0xe8] sm:$0xff] }
  0xcc   : > { %1007 = vmatpush1.bf16.msra.mxu0 %v1006_v18  ;;  %v1092_v18 = vpack.c.bf16 %v625_v12, %v623_v11  ;;  %v1108_v43 = vpack.c.bf16 %v641_v41, %v639_v40  ;;  %v645_v47 = vld [vmem:[%s1860_s17 + $0xf8] sm:$0xff]  ;;  %v642_v50 = vld [vmem:[%s1860_s17 + $0xe0] sm:$0xff]  ;;  %v647_v53 = vld [vmem:[%s1860_s17 + $0x108] sm:$0xff] }
  0xcd   : > { %1009 = vmatprep.subr.bf16.mxu0 %v1008_v21  ;;  %1071 = vmatpush1.bf16.msra.mxu1 %v1070_v48  ;;  %v1082_v21 = vpack.c.bf16 %v422_v15, %v418_v14  ;;  %v1112_v49 = vpack.c.bf16 %v645_v47, %v643_v46  ;;  %v646_v56 = vld [vmem:[%s1860_s17 + $0x100] sm:$0xff]  ;;  %v651_v59 = vld [vmem:[%s1860_s17 + $0x128] sm:$0xff]  ;;  %v661_v8 = vld [vmem:[%s1860_s17 + $0x178] sm:$0xff] }
  0xce   : > { %1073 = vmatprep.subr.bf16.mxu1 %v1072_v51  ;;  %v644_v51 = vld [vmem:[%s1860_s17 + $0xf0] sm:$0xff]  ;;  %v650_v62 = vld [vmem:[%s1860_s17 + $0x120] sm:$0xff]  ;;  %v655_v1 = vld [vmem:[%s1860_s17 + $0x148] sm:$0xff] }
  0xcf   : > { %v1114_v52 = vpack.c.bf16 %v644_v51, %v642_v50  ;;  %v654_v4 = vld [vmem:[%s1860_s17 + $0x140] sm:$0xff]  ;;  %v660_v11 = vld [vmem:[%s1860_s17 + $0x170] sm:$0xff]  ;;  %v665_v14 = vld [vmem:[%s1860_s17 + $0x198] sm:$0xff] }
  0xd0   : > { %1011 = vmatpush1.bf16.msra.mxu0 %v1010_v30  ;;  %v1098_v30 = vpack.c.bf16 %v628_v27, %v626_v26  ;;  %v667_v19 = vld [vmem:[%s1860_s17 + $0x1a8] sm:$0xff]  ;;  %v669_v20 = vld [vmem:[%s1860_s17 + $0x1b8] sm:$0xff]  ;;  %v666_v22 = vld [vmem:[%s1860_s17 + $0x1a0] sm:$0xff] }
  0xd1   : > { %1013 = vmatprep.subr.bf16.mxu0 %v1012_v33  ;;  %1075 = vmatpush1.bf16.msra.mxu1 %v1074_v60  ;;  %v632_v33 = vld [vmem:[%s1860_s17 + $0x90] sm:$0xff]  ;;  %v653_v60 = vld [vmem:[%s1860_s17 + $0x138] sm:$0xff]  ;;  %v670_v28 = vld [vmem:[%s1860_s17 + $0x1c0] sm:$0xff] }
  0xd2   : > { %1077 = vmatprep.subr.bf16.mxu1 %v1076_v63  ;;  %v1102_v36 = vpack.c.bf16 %v632_v33, %v630_v32  ;;  %v1120_v61 = vpack.c.bf16 %v653_v60, %v651_v59  ;;  %v652_v63 = vld [vmem:[%s1860_s17 + $0x130] sm:$0xff]  ;;  %v673_v26 = vld [vmem:[%s1860_s17 + $0x1d8] sm:$0xff]  ;;  %v674_v34 = vld [vmem:[%s1860_s17 + $0x1e0] sm:$0xff] }
  0xd3   : > { %v1122_v0 = vpack.c.bf16 %v652_v63, %v650_v62  ;;  %v668_v23 = vld [vmem:[%s1860_s17 + $0x1b0] sm:$0xff]  ;;  %v677_v32 = vld [vmem:[%s1860_s17 + $0x1f8] sm:$0xff] }
  0xd4   : > { %1015 = vmatpush1.bf16.msra.mxu0 %v1014_v42  ;;  %v1106_v42 = vpack.c.bf16 %v636_v39, %v634_v38  ;;  %v672_v29 = vld [vmem:[%s1860_s17 + $0x1d0] sm:$0xff] }
  0xd5   : > { %1017 = vmatprep.subr.bf16.mxu0 %v1016_v45  ;;  %1079 = vmatpush1.bf16.msra.mxu1 %v1078_v10  ;;  %v640_v45 = vld [vmem:[%s1860_s17 + $0xd0] sm:$0xff]  ;;  %v658_v10 = vld [vmem:[%s1860_s17 + $0x160] sm:$0xff] }
  0xd6   : > { %1081 = vmatprep.subr.bf16.mxu1 %v1080_v13  ;;  %v1110_v48 = vpack.c.bf16 %v640_v45, %v638_v44  ;;  %v1130_v12 = vpack.c.bf16 %v660_v11, %v658_v10  ;;  %v663_v13 = vld [vmem:[%s1860_s17 + $0x188] sm:$0xff]  ;;  %v676_v35 = vld [vmem:[%s1860_s17 + $0x1f0] sm:$0xff] }
  0xd7   : > { %v1132_v15 = vpack.c.bf16 %v665_v14, %v663_v13  ;;  %v612_v11 = vld [vmem:[#allocation2 + $0x10] sm:$0xff] }
  0xd8   : > { %1019 = vmatpush1.bf16.msra.mxu0 %v1018_v54  ;;  %v649_v54 = vld [vmem:[%s1860_s17 + $0x118] sm:$0xff] }
  0xd9   : > { %1085 = vmatprep.subr.bf16.mxu0 %v1084_v57  ;;  %1083 = vmatpush1.bf16.msra.mxu1 %v1082_v21  ;;  %v1116_v55 = vpack.c.bf16 %v649_v54, %v647_v53  ;;  %v1136_v21 = vpack.c.bf16 %v669_v20, %v667_v19 }
  0xda   : > { %1148 = vmatprep.subr.bf16.mxu1 %v1084_v57  ;;  %v648_v57 = vld [vmem:[%s1860_s17 + $0x110] sm:$0xff] }
  0xdb   : > { %489 = vmatmul.mubr.f32.vlgmr.msra.gmra.mrb[0].mxu0 %v292_v2  ;;  %v1118_v58 = vpack.c.bf16 %v648_v57, %v646_v56 }
  0xdc   : > { %494 = vmatprep.mubr.f32.mxu0 %v295_v6  ;;  %1087 = vmatpush1.bf16.msra.mxu0 %v1086_v5 }
  0xdd   : > { %1089 = vmatprep.subr.bf16.mxu0 %v1088_v7  ;;  %566 = vmatmul.mubr.f32.vlgmr.msra.gmra.mrb[0].mxu1 %v292_v2  ;;  %v657_v2 = vld [vmem:[%s1860_s17 + $0x158] sm:$0xff] }
  0xde   : > { %571 = vmatprep.mubr.f32.mxu1 %v295_v6  ;;  %1164 = vmatpush1.bf16.msra.mxu1 %v1086_v5  ;;  %v1124_v3 = vpack.c.bf16 %v657_v2, %v655_v1  ;;  %v656_v5 = vld [vmem:[%s1860_s17 + $0x150] sm:$0xff] }
  0xdf   : > { %495 = vmatmul.mubr.f32.gmra.mrb[2].mxu0 %v294_v16  ;;  %1149 = vmatprep.subr.bf16.mxu1 %v1088_v7  ;;  %v1126_v6 = vpack.c.bf16 %v656_v5, %v654_v4  ;;  %v659_v7 = vld [vmem:[%s1860_s17 + $0x168] sm:$0xff]  ;;  %v610_v5 = vld [vmem:[#allocation2] sm:$0xff] }
  0xe0   : > { %1091 = vmatpush1.bf16.msra.mxu0 %v1090_v17  ;;  %v1128_v9 = vpack.c.bf16 %v661_v8, %v659_v7 }
  0xe1   : > { %1093 = vmatprep.subr.bf16.mxu0 %v1092_v18  ;;  %572 = vmatmul.mubr.f32.gmra.mrb[2].mxu1 %v294_v16  ;;  %v662_v16 = vld [vmem:[%s1860_s17 + $0x180] sm:$0xff] }
  0xe2   : > { %1165 = vmatpush1.bf16.msra.mxu1 %v1090_v17  ;;  %v664_v17 = vld [vmem:[%s1860_s17 + $0x190] sm:$0xff] }
  0xe3   : > { %1150 = vmatprep.subr.bf16.mxu1 %v1092_v18  ;;  %v1134_v18 = vpack.c.bf16 %v664_v17, %v662_v16 }
  0xe4   : > { %1095 = vmatpush1.bf16.msra.mxu0 %v1094_v24 }
  0xe5   : > { %1097 = vmatprep.subr.bf16.mxu0 %v1096_v25 }
  0xe6   : > { %1166 = vmatpush1.bf16.msra.mxu1 %v1094_v24  ;;  %v1138_v24 = vpack.c.bf16 %v668_v23, %v666_v22 }
  0xe7   : > { %1151 = vmatprep.subr.bf16.mxu1 %v1096_v25  ;;  %v671_v25 = vld [vmem:[%s1860_s17 + $0x1c8] sm:$0xff] }
  0xe8   : > { %1099 = vmatpush1.bf16.msra.mxu0 %v1098_v30  ;;  %v1140_v27 = vpack.c.bf16 %v673_v26, %v671_v25 }
  0xe9   : > { %1101 = vmatprep.subr.bf16.mxu0 %v1100_v31 }
  0xea   : > { %1167 = vmatpush1.bf16.msra.mxu1 %v1098_v30  ;;  %v1142_v30 = vpack.c.bf16 %v672_v29, %v670_v28 }
  0xeb   : > { %1152 = vmatprep.subr.bf16.mxu1 %v1100_v31  ;;  %v675_v31 = vld [vmem:[%s1860_s17 + $0x1e8] sm:$0xff] }
  0xec   : > { %1103 = vmatpush1.bf16.msra.mxu0 %v1102_v36  ;;  %v1144_v33 = vpack.c.bf16 %v677_v32, %v675_v31 }
  0xed   : > { %1105 = vmatprep.subr.bf16.mxu0 %v1104_v37 }
  0xee   : > { %1168 = vmatpush1.bf16.msra.mxu1 %v1102_v36  ;;  %v1146_v36 = vpack.c.bf16 %v676_v35, %v674_v34 }
  0xef   : > { %1153 = vmatprep.subr.bf16.mxu1 %v1104_v37 }
  0xf0   : > { %1107 = vmatpush1.bf16.msra.mxu0 %v1106_v42 }
  0xf1   : > { %1109 = vmatprep.subr.bf16.mxu0 %v1108_v43 }
  0xf2   : > { %1169 = vmatpush1.bf16.msra.mxu1 %v1106_v42 }
  0xf3   : > { %1154 = vmatprep.subr.bf16.mxu1 %v1108_v43 }
  0xf4   : > { %1111 = vmatpush1.bf16.msra.mxu0 %v1110_v48 }
  0xf5   : > { %1113 = vmatprep.subr.bf16.mxu0 %v1112_v49 }
  0xf6   : > { %1170 = vmatpush1.bf16.msra.mxu1 %v1110_v48 }
  0xf7   : > { %1155 = vmatprep.subr.bf16.mxu1 %v1112_v49 }
  0xf8   : > { %1115 = vmatpush1.bf16.msra.mxu0 %v1114_v52 }
  0xf9   : > { %1117 = vmatprep.subr.bf16.mxu0 %v1116_v55 }
  0xfa   : > { %1171 = vmatpush1.bf16.msra.mxu1 %v1114_v52 }
  0xfb   : > { %1156 = vmatprep.subr.bf16.mxu1 %v1116_v55 }
  0xfc   : > { %1119 = vmatpush1.bf16.msra.mxu0 %v1118_v58 }
  0xfd   : > { %1121 = vmatprep.subr.bf16.mxu0 %v1120_v61 }
  0xfe   : > { %1172 = vmatpush1.bf16.msra.mxu1 %v1118_v58 }
  0xff   : > { %1157 = vmatprep.subr.bf16.mxu1 %v1120_v61 }
 0x100   : > { %1123 = vmatpush1.bf16.msra.mxu0 %v1122_v0 }
 0x101   : > { %1125 = vmatprep.subr.bf16.mxu0 %v1124_v3 }
 0x102   : > { %1173 = vmatpush1.bf16.msra.mxu1 %v1122_v0 }
 0x103   : > { %1158 = vmatprep.subr.bf16.mxu1 %v1124_v3 }
 0x104   : > { %1127 = vmatpush1.bf16.msra.mxu0 %v1126_v6 }
 0x105   : > { %1129 = vmatprep.subr.bf16.mxu0 %v1128_v9 }
 0x106   : > { %1174 = vmatpush1.bf16.msra.mxu1 %v1126_v6  ;;  %v611_v6 = vld [vmem:[#allocation2 + $0x8] sm:$0xff] }
 0x107   : > { %1159 = vmatprep.subr.bf16.mxu1 %v1128_v9 }
 0x108   : > { %1131 = vmatpush1.bf16.msra.mxu0 %v1130_v12 }
 0x109   : > { %1133 = vmatprep.subr.bf16.mxu0 %v1132_v15 }
 0x10a   : > { %1175 = vmatpush1.bf16.msra.mxu1 %v1130_v12  ;;  %v613_v12 = vld [vmem:[#allocation2 + $0x18] sm:$0xff] }
 0x10b   : > { %1160 = vmatprep.subr.bf16.mxu1 %v1132_v15 }
 0x10c   : > { %1135 = vmatpush1.bf16.msra.mxu0 %v1134_v18 }
 0x10d   : > { %1137 = vmatprep.subr.bf16.mxu0 %v1136_v21 }
 0x10e   : > { %1176 = vmatpush1.bf16.msra.mxu1 %v1134_v18 }
 0x10f   : > { %1161 = vmatprep.subr.bf16.mxu1 %v1136_v21 }
 0x110   : > { %1139 = vmatpush1.bf16.msra.mxu0 %v1138_v24 }
 0x111   : > { %1141 = vmatprep.subr.bf16.mxu0 %v1140_v27 }
 0x112   : > { %1177 = vmatpush1.bf16.msra.mxu1 %v1138_v24 }
 0x113   : > { %1162 = vmatprep.subr.bf16.mxu1 %v1140_v27 }
 0x114   : > { %1143 = vmatpush1.bf16.msra.mxu0 %v1142_v30 }
 0x115   : > { %1145 = vmatprep.subr.bf16.mxu0 %v1144_v33 }
 0x116   : > { %1178 = vmatpush1.bf16.msra.mxu1 %v1142_v30 }
 0x117   : > { %1163 = vmatprep.subr.bf16.mxu1 %v1144_v33 }
 0x118   : > { %1147 = vmatpush1.bf16.msra.mxu0 %v1146_v36 }
 0x11a   : > { %1179 = vmatpush1.bf16.msra.mxu1 %v1146_v36 }
 0x1ae   : > { %v490_v37 = vpop.f32.mrb[0].mxu0 }
 0x1af   : > { %v938_v38 = vmul.f32 -1.442695, %v490_v37  ;;  %v492_v39 = vpop.f32.mrb[1].mxu0 }
 0x1b0   : > { %v939_v40 = vmul.f32 -1.442695, %v492_v39  ;;  %v567_v45 = vpop.f32.mrb[0].mxu1 }
 0x1b1   : > { %1300 = vpow2.f32 %v938_v38  ;;  %v569_v46 = vpop.f32.mrb[1].mxu1 }
 0x1b2   : > { %1302 = vpow2.f32 %v939_v40  ;;  %v496_v41 = vpop.f32.mrb[2].mxu0 }
 0x1b3   : > { %v940_v42 = vmul.f32 -1.442695, %v496_v41  ;;  %v498_v43 = vpop.f32.mrb[3].mxu0 }
 0x1b4   : > { %v941_v44 = vmul.f32 -1.442695, %v498_v43  ;;  %v573_v50 = vpop.f32.mrb[2].mxu1 }
 0x1b5   : > { %1304 = vpow2.f32 %v940_v42  ;;  %v575_v52 = vpop.f32.mrb[3].mxu1 }
 0x1b6   : > { %1306 = vpow2.f32 %v941_v44 }
 0x1bb   : > { %v1301_v47 = vpop.eup %1300 }
 0x1bc   : > { %v1303_v48 = vpop.eup %1302  ;;  %v590_v49 = vadd.f32 1.0, %v1301_v47 }
 0x1bd   : > { %v591_v51 = vadd.f32 1.0, %v1303_v48 }
 0x1be   : > { %1308 = vrcp.f32 %v590_v49 }
 0x1bf   : > { %v1305_v53 = vpop.eup %1304  ;;  %1310 = vrcp.f32 %v591_v51 }
 0x1c0   : > { %v1307_v54 = vpop.eup %1306  ;;  %v592_v55 = vadd.f32 1.0, %v1305_v53 }
 0x1c1   : > { %v593_v56 = vadd.f32 1.0, %v1307_v54 }
 0x1c2   : > { %1312 = vrcp.f32 %v592_v55 }
 0x1c3   : > { %1314 = vrcp.f32 %v593_v56 }
 0x1c8   : > { %v1309_v57 = vpop.eup %1308 }
 0x1c9   : > { %v1311_v58 = vpop.eup %1310  ;;  %v602_v59 = vmul.f32 %v1309_v57, %v490_v37 }
 0x1ca   : > { %v603_v60 = vmul.f32 %v1311_v58, %v492_v39 }
 0x1cb   : > { %v606_v61 = vmul.f32 %v602_v59, %v567_v45 }
 0x1cc   : > { %v1313_v62 = vpop.eup %1312  ;;  %v607_v63 = vmul.f32 %v603_v60, %v569_v46 }
 0x1cd   : > { %v1315_v0 = vpop.eup %1314  ;;  %v604_v1 = vmul.f32 %v1313_v62, %v496_v41 }
 0x1ce   : > { %v605_v2 = vmul.f32 %v1315_v0, %v498_v43  ;;  %742 = vmatprep.mubr.f32.mxu0 %v607_v63 }
 0x1cf   : > { %v608_v3 = vmul.f32 %v604_v1, %v573_v50  ;;  %743 = vmatmul.mubr.f32.vlgmr.msra.gmra.mrb[4].mxu0 %v606_v61 }
 0x1d0   : > { %v609_v4 = vmul.f32 %v605_v2, %v575_v52 }
 0x1d2   : > { %748 = vmatprep.mubr.f32.mxu1 %v609_v4 }
 0x1d3   : > { %749 = vmatmul.mubr.f32.vlgmr.msra.gmra.mrb[4].mxu1 %v608_v3 }
 0x2a2   : > { %v744_v7 = vpop.f32.mrb[4].mxu0 }
 0x2a3   : > { %v755_v8 = vadd.f32 %v744_v7, %v610_v5  ;;  %v746_v9 = vpop.f32.mrb[5].mxu0 }
 0x2a4   : > { %v756_v10 = vadd.f32 %v746_v9, %v611_v6  ;;  %766 = sbr.rel (%p942_p12) target bundleno = 691 (0x2b3), region = 52 }
 0x2a5   : > { %759 = vst [vmem:[#allocation2] sm:$0xff] %v755_v8 }
 0x2a6   : > { %760 = vst [vmem:[#allocation2 + $0x8] sm:$0xff] %v756_v10  ;;  %v750_v13 = vpop.f32.mrb[4].mxu1 }
 0x2a7   : > { %v757_v14 = vadd.f32 %v750_v13, %v612_v11  ;;  %v752_v15 = vpop.f32.mrb[5].mxu1 }
 0x2a8   : > { %v758_v16 = vadd.f32 %v752_v15, %v613_v12 }
 0x2a9   : > { %761 = vst [vmem:[#allocation2 + $0x10] sm:$0xff] %v757_v14 }
 0x2aa   : > { %762 = vst [vmem:[#allocation2 + $0x18] sm:$0xff] %v758_v16 }
 0x2ac   : > { %v767_v17 = vld [vmem:[#allocation2] sm:$0xff] }
 0x2ad   : > { %v768_v18 = vld [vmem:[#allocation2 + $0x8] sm:$0xff]  ;;  %771 = vst [vmem:[%s1862_s28] sm:$0xff] %v767_v17 }
 0x2ae   : > { %772 = vst [vmem:[%s1862_s28 + $0x8] sm:$0xff] %v768_v18 }
 0x2b0   : > { %v769_v19 = vld [vmem:[#allocation2 + $0x10] sm:$0xff] }
 0x2b1   : > { %773 = vst [vmem:[%s1862_s28 + $0x10] sm:$0xff] %v769_v19  ;;  %v770_v20 = vld [vmem:[#allocation2 + $0x18] sm:$0xff] }
 0x2b2   : > { %774 = vst [vmem:[%s1862_s28 + $0x18] sm:$0xff] %v770_v20 }
 0x2b3 PF: > { %s955_s27 = sshll.u32 %s1520_s19, 9  ;;  %s2182_s9 = sld [smem:[#allocation21_spill]] }
 0x2b4   : > { %s790_s3 = sshll.u32 %s1862_s28, 4  ;;  %s776_s30 = scalar_lea.sflag [#allocation5], %s1842_s0  ;;  %s2073_s3 = int_to_ptr.vmem [resolvable:$true] %s790_s3 }
 0x2b5   : > { %s1406_s21 = scalar_lea.vmem %s2073_s3, 512  ;;  %p2183_p11 = scmp.ne.s32.totalorder %s2170_s4, 0 }
 0x2b6   : > { %p1407_p13 = scmp.ne.s32.totalorder %s2073_s3, %s1406_s21  ;;  %s1543_s5 = smov [#allocation9]  }
 0x2b7   : > { %s1410_s26 = sshll.u32 %s1543_s5, 4  ;;  %s1411_s26 = int_to_ptr.vmem [resolvable:$false] %s1410_s26 }
 0x2b8   : > { %p1408_p6 = pnand %p1407_p13, %p2183_p11  ;;  %s1412_s19 = scalar_lea.vmem %s1411_s26, 1024 }
 0x2b9   : > { %s2070_s12 = scalar_lea.hbm %s2182_s9, %s955_s27  ;;  %p1413_p5 = scmp.lt.s32.totalorder %s2073_s3, %s1411_s26 }
 0x2ba   : > { %p1409_p10 = pneg %p1408_p6  ;;  %p1414_p1 = scmp.lt.s32.totalorder %s1412_s19, %s1406_s21 }
 0x2bc   : > { %p1415_p0 = por %p1414_p1, %p1413_p5 }
 0x2be   : > { %p1416_p9 = pnand %p1415_p0, %p1409_p10 }
 0x2c0   : > { %1419 = shalt.err (!%p1416_p9)
}
 0x2c1   : > { %s1420_s8 = scalar_lea.hbm %s2070_s12, 512  ;;  %s1424_s11 = scalar_lea.hbm %s2182_s9, 1024 }
 0x2c2   : > { %p1421_p2 = scmp.ne.s32.totalorder %s2070_s12, %s1420_s8  ;;  %p1425_p7 = scmp.lt.u32.totalorder %s2070_s12, %s2182_s9 }
 0x2c3   : > { %p1426_p8 = scmp.lt.u32.totalorder %s1424_s11, %s1420_s8  ;;  %p1428_p13 = scmp.lt.u32.totalorder %s1420_s8, %s2070_s12 }
 0x2c4   : > { %p1422_p3 = pnand %p1421_p2, %p2183_p11 }
 0x2c5   : > { %p1427_p12 = por %p1426_p8, %p1425_p7 }
 0x2c6   : > { %p1423_p4 = pneg %p1422_p3 }
 0x2c7   : > { %p1429_p6 = por %p1428_p13, %p1427_p12 }
 0x2c9   : > { %p1430_p10 = pnand %p1429_p6, %p1423_p4 }
 0x2cb   : > { %1433 = shalt.err (!%p1430_p10)
}
 0x2cc   : > { %s1544_s7 = smov 256   ;;  %s1545_s1 = smov 16  }
 0x2cd   : > { %1186 = dma.vmem_to_hbm [thread:$0]  (%p2183_p11), %s2073_s3, 512, %s2070_s12, %s776_s30, %s1544_s7, %s1544_s7, %s1545_s1  }
 0x2ce PF: > { %p1203_p5 = scmp.ge.s32.totalorder %s1532_s22, 2  ;;  %s805_s17 = sand.u32 1, %s1504_s15  }
 0x2cf   : > { %p2184_p1 = scmp.ne.s32.totalorder %s2172_s23, 0  ;;  %s806_s28 = scalar_lea.sflag [#allocation5], %s805_s17 }
 0x2d1   : > { %p1199_p0 = pnand %p1203_p5, %p2184_p1 }
 0x2d3   : > { %1487 = dma.done.wait (!%p1199_p0), %s806_s28, 512  }
 0x2d4   : > { %1489 = vsyncadd (!%p1199_p0), %s806_s28, 4294966784  ;;  %s22_s22 = sadd.s32 1, %s1532_s22   ;;  %s2185_s27 = sld [smem:[#allocation16_spill]] }
 0x2d5   : > { %p19_p9 = scmp.ge.s32.totalorder %s22_s22, 6   ;;  %s2186_s4 = sld [smem:[#allocation13_spill]] }
 0x2d6   : > { %s2187_s17 = sld [smem:[#allocation18_spill]]  ;;  %s2188_s19 = sld [smem:[#allocation14_spill]] }
 0x2d7   : > { %s2189_s0 = sld [smem:[#allocation15_spill]]  ;;  %s2190_s21 = sld [smem:[#allocation17_spill]] }
 0x2d8   : > { %s2191_s12 = smov %s1496_s13  ;;  %s2192_s13 = smov %s1500_s14 }
 0x2d9   : > { %s2194_s15 = smov %s1508_s16  ;;  %s2196_s18 = smov %s1524_s20 }
 0x2da   : > { %s2193_s14 = smov %s2185_s27  ;;  %21 = sbr.rel (!%p19_p9) target bundleno = 15 (0xf), region = 109 }
 0x2db   : > { %s2195_s16 = smov %s2186_s4 }
 0x2dd   : > { %s2197_s20 = smov %s2189_s0 }
 0x2e1   :  { %811 = vsyncpa [#allocation4], 1 }
 0x2e2   :  { %813 = vsyncpa [#allocation4 + $0x1], 1 }
 0x2e3   :  { %814 = vsyncpa [#allocation7], 1 }
 0x2e4   :  { %816 = vsyncpa [#allocation7 + $0x1], 1 }
 0x2e5   :  { %817 = vsyncpa [#allocation5], 1 }
 0x2e6   :  { %819 = vsyncpa [#allocation5 + $0x1], 1 }

</bundles_post_ra>
